<compile_context>
chip_gen: v7x
topology: tpu7x:2x2x1
jax: 0.10.0
libtpu: 0.0.40
codegen_flags: <defaults>
</compile_context>

<pallas_src>
import jax
import jax.numpy as jnp
from jax.experimental import pallas as pl
from jax.experimental.pallas import tpu as pltpu


def _head_kernel(emb_h0_ref, emb_h1_ref, drug_pair_ref, dv_pair_ref,
                 w_agg_m0_ref, w_agg_x0_ref, w_agg_m1_ref, w_agg_x1_ref,
                 w_d_fused_ref, w_v_fused_ref, w_fc1_c_ref,
                 w_fc2_ref, w_out_ref, b_pack_ref,
                 out_ref):
    emb_dim = w_agg_m0_ref.shape[1]
    input_dim = w_d_fused_ref.shape[1]
    inner_dim = w_fc2_ref.shape[1]

    # Packed biases: one [4, maxw] slab, static leading-lane slices (no shifts).
    b = b_pack_ref[...]
    b_agg = b[0:1, :emb_dim]
    b_fc1 = b[1:2, :input_dim]     # already includes b_mix @ (W_fc1_h + W_fc1_t)
    b_fc2 = b[2:3, :inner_dim]
    b_out = b[3:4, :1]

    # --- _interaction_aggregation + _aggregation -----------------------------
    # sum/max over n_memory are sublane reductions (axis=1) -> XLU, ~free next
    # to the MXU work.  The mean's 1/n_memory is folded into w_agg_m* in the
    # wrapper, so a plain sum suffices here.
    e0 = emb_h0_ref[...]                                     # [TB, n_mem, emb]
    e1 = emb_h1_ref[...]
    sum0 = jnp.sum(e0, axis=1)
    max0 = jnp.max(e0, axis=1)
    sum1 = jnp.sum(e1, axis=1)
    max1 = jnp.max(e1, axis=1)
    # split-weight accumulating dots replace concat([mean0,max0,mean1,max1]).
    cell_emb = (jnp.dot(sum0, w_agg_m0_ref[...], preferred_element_type=jnp.float32)
                + jnp.dot(max0, w_agg_x0_ref[...], preferred_element_type=jnp.float32)
                + jnp.dot(sum1, w_agg_m1_ref[...], preferred_element_type=jnp.float32)
                + jnp.dot(max1, w_agg_x1_ref[...], preferred_element_type=jnp.float32)
                + b_agg)                                     # [TB, emb]

    # --- (mix_linear ∘ fc1) fused -> relu -> fc2 -> relu -> out ---------------
    # drug_pair = [drug_a | drug_b], dv_pair = [dv_a | dv_b] (lane concats done
    # in the wrapper).  w_d_fused / w_v_fused are the pre-composed
    # [W_mix_d @ W_fc1_h ; W_mix_d @ W_fc1_t] (resp. dv) stacks, so each path
    # is one MXU push with a deeper contraction dim.
    xc = (jnp.dot(drug_pair_ref[...], w_d_fused_ref[...],
                  preferred_element_type=jnp.float32)
          + jnp.dot(dv_pair_ref[...], w_v_fused_ref[...],
                    preferred_element_type=jnp.float32)
          + jnp.dot(cell_emb, w_fc1_c_ref[...],
                    preferred_element_type=jnp.float32)
          + b_fc1)                                           # [TB, input_dim]
    xc = jnp.maximum(xc, 0.0)                                # dropout = identity (eval)
    xc = jnp.dot(xc, w_fc2_ref[...], preferred_element_type=jnp.float32) + b_fc2
    xc = jnp.maximum(xc, 0.0)
    out_ref[...] = (jnp.dot(xc, w_out_ref[...], preferred_element_type=jnp.float32)
                    + b_out)                                 # [TB, 1]


def _pick_tile_b(batch, max_tile=256):
    """Batch tile: full batch if small, else a sublane-aligned divisor."""
    if batch <= max_tile:
        return batch
    for t in range(max_tile, 7, -8):
        if batch % t == 0:
            return t
    return batch  # fallback: single tile


def binary_class_dv_ppi_mlp_head(drug_a, dv_drug_a, drug_b, dv_drug_b, cells,
                                 neighbor_table, params, *, tile_b=None):
    """cells: int32 [B, 1]; neighbor_table: int32 [num_cells, n_hop, n_memory]."""
    B, input_dim = drug_a.shape
    dv_input_dim = dv_drug_a.shape[1]
    emb_table = params["protein_embedding"]
    emb_dim = emb_table.shape[1]
    inner_dim = params["w_fc2"].shape[1]
    n_memory = neighbor_table.shape[2]

    # --- XLA glue: data-dependent gathers ------------------------------------
    cell_ids = cells[:, 0]
    nbr = neighbor_table[cell_ids]               # [B, n_hop, n_memory]
    emb_h0 = emb_table[nbr[:, 0]]                # [B, n_memory, emb]
    emb_h1 = emb_table[nbr[:, 1]]                # [B, n_memory, emb]

    # a/b pair concatenated along features (cheap XLA layout op) -> one MXU
    # push per path in-kernel with a deeper contraction dim.
    drug_pair = jnp.concatenate([drug_a, drug_b], axis=1)    # [B, 2*input_dim]
    dv_pair = jnp.concatenate([dv_drug_a, dv_drug_b], axis=1)  # [B, 2*dv_input_dim]

    # Pre-slice w_agg along the former concat axis; fold the mean's 1/n_memory.
    w_agg = params["w_agg"]                      # [4*emb, emb]
    inv_m = jnp.float32(1.0 / n_memory)
    w_agg_m0 = w_agg[0 * emb_dim:1 * emb_dim] * inv_m
    w_agg_x0 = w_agg[1 * emb_dim:2 * emb_dim]
    w_agg_m1 = w_agg[2 * emb_dim:3 * emb_dim] * inv_m
    w_agg_x1 = w_agg[3 * emb_dim:4 * emb_dim]

    # Fuse mix_linear into fc1 (no nonlinearity between them in the forward):
    #   heads @ Wh + tails @ Wt
    #     = drug_a @ (Wd@Wh) + drug_b @ (Wd@Wt)
    #     + dv_a  @ (Wv@Wh) + dv_b  @ (Wv@Wt) + b_mix @ (Wh + Wt)
    w_mix = params["w_mix"]                      # [input_dim + dv_input_dim, input_dim]
    w_mix_d = w_mix[:input_dim]
    w_mix_dv = w_mix[input_dim:]
    w_fc1 = params["w_fc1"]                      # [2*input_dim + inner, input_dim]
    w_fc1_h = w_fc1[:input_dim]
    w_fc1_t = w_fc1[input_dim:2 * input_dim]
    w_fc1_c = w_fc1[2 * input_dim:]
    w_d_fused = jnp.concatenate([w_mix_d @ w_fc1_h, w_mix_d @ w_fc1_t], axis=0)
    w_v_fused = jnp.concatenate([w_mix_dv @ w_fc1_h, w_mix_dv @ w_fc1_t], axis=0)
    b_fc1_fused = params["b_fc1"] + params["b_mix"] @ (w_fc1_h + w_fc1_t)

    w_fc2 = params["w_fc2"]                      # [input_dim, inner]
    w_out = params["w_out"]                      # [inner, 1]

    # Pack the 4 tiny biases into one slab -> one DMA, static slices in-kernel.
    maxw = max(input_dim, inner_dim, emb_dim)

    def _pad(bias):
        bias = bias.reshape(1, -1).astype(jnp.float32)
        return jnp.pad(bias, ((0, 0), (0, maxw - bias.shape[1])))

    b_pack = jnp.concatenate(
        [_pad(params["b_agg"]), _pad(b_fc1_fused),
         _pad(params["b_fc2"]), _pad(params["b_out"])], axis=0)  # [4, maxw]

    # --- grid over the batch dimension ---------------------------------------
    if tile_b is None:
        tile_b = _pick_tile_b(B)
    assert B % tile_b == 0, "batch must be divisible by the batch tile"
    n_tiles = B // tile_b

    batch_map3 = lambda i: (i, 0, 0)    # [B, n_memory, emb] tiles
    batch_map2 = lambda i: (i, 0)       # [B, feat] tiles
    w_map = lambda i: (0, 0)            # weights / biases stay resident

    in_specs = [
        pl.BlockSpec((tile_b, n_memory, emb_dim), batch_map3),    # emb_h0
        pl.BlockSpec((tile_b, n_memory, emb_dim), batch_map3),    # emb_h1
        pl.BlockSpec((tile_b, 2 * input_dim), batch_map2),        # drug_pair
        pl.BlockSpec((tile_b, 2 * dv_input_dim), batch_map2),     # dv_pair
        pl.BlockSpec(w_agg_m0.shape, w_map),
        pl.BlockSpec(w_agg_x0.shape, w_map),
        pl.BlockSpec(w_agg_m1.shape, w_map),
        pl.BlockSpec(w_agg_x1.shape, w_map),
        pl.BlockSpec(w_d_fused.shape, w_map),
        pl.BlockSpec(w_v_fused.shape, w_map),
        pl.BlockSpec(w_fc1_c.shape, w_map),
        pl.BlockSpec(w_fc2.shape, w_map),
        pl.BlockSpec(w_out.shape, w_map),
        pl.BlockSpec(b_pack.shape, w_map),
    ]
    out_spec = pl.BlockSpec((tile_b, 1), batch_map2)

    return pl.pallas_call(
        _head_kernel,
        out_shape=jax.ShapeDtypeStruct((B, 1), jnp.float32),
        grid=(n_tiles,),
        in_specs=in_specs,
        out_specs=out_spec,
        compiler_params=pltpu.CompilerParams(
            dimension_semantics=("parallel",)),   # megacore sharding on v7x
    )(emb_h0, emb_h1, drug_pair, dv_pair,
      w_agg_m0, w_agg_x0, w_agg_m1, w_agg_x1,
      w_d_fused, w_v_fused, w_fc1_c, w_fc2, w_out, b_pack)


def init_params(key, *, input_dim, dv_input_dim, inner_dim, protein_num, n_hop):
    ks = jax.random.split(key, 12)
    emb_dim = inner_dim

    def lin(kw, fan_in, fan_out):
        bound = 1.0 / jnp.sqrt(fan_in)
        return jax.random.uniform(kw, (fan_in, fan_out), jnp.float32, -bound, bound)

    return {
        "protein_embedding": jax.random.normal(ks[0], (protein_num, emb_dim), jnp.float32),
        "w_agg": lin(ks[1], emb_dim * 2 * n_hop, emb_dim),
        "b_agg": jax.random.normal(ks[2], (1, emb_dim), jnp.float32) * 0.01,
        "w_mix": lin(ks[3], dv_input_dim + input_dim, input_dim),
        "b_mix": jax.random.normal(ks[4], (1, input_dim), jnp.float32) * 0.01,
        "w_fc1": lin(ks[5], 2 * input_dim + inner_dim, input_dim),
        "b_fc1": jax.random.normal(ks[6], (1, input_dim), jnp.float32) * 0.01,
        "w_fc2": lin(ks[7], input_dim, inner_dim),
        "b_fc2": jax.random.normal(ks[8], (1, inner_dim), jnp.float32) * 0.01,
        "w_out": lin(ks[9], inner_dim, 1),
        "b_out": jax.random.normal(ks[10], (1, 1), jnp.float32) * 0.01,
    }


def _reference(drug_a, dv_drug_a, drug_b, dv_drug_b, cells, neighbor_table, params):
    """Pure-JAX replica of the PyTorch forward (for correctness checking)."""
    emb_table = params["protein_embedding"]
    nbr = neighbor_table[cells[:, 0]]                    # [B, n_hop, n_memory]
    feats = []
    for hop in range(nbr.shape[1]):
        e = emb_table[nbr[:, hop]]                       # [B, n_memory, emb]
        feats.append(jnp.concatenate([e.mean(axis=1), e.max(axis=1)], axis=-1))
    cell_emb = jnp.concatenate(feats, axis=-1) @ params["w_agg"] + params["b_agg"]
    heads = jnp.concatenate([drug_a, dv_drug_a], -1) @ params["w_mix"] + params["b_mix"]
    tails = jnp.concatenate([drug_b, dv_drug_b], -1) @ params["w_mix"] + params["b_mix"]
    xc = jnp.concatenate([heads, tails, cell_emb], -1) @ params["w_fc1"] + params["b_fc1"]
    xc = jnp.maximum(xc, 0.0)
    xc = xc @ params["w_fc2"] + params["b_fc2"]
    xc = jnp.maximum(xc, 0.0)
    return xc @ params["w_out"] + params["b_out"]


if __name__ == "__main__":
    # Small shapes consistent with the module's forward.
    B = 8              # batch
    INPUT_DIM = 64     # drug feature dim
    DV_INPUT_DIM = 32  # dv drug feature dim
    INNER_DIM = 32     # emb_dim / inner_dim
    N_HOP = 2
    N_MEMORY = 16
    NUM_CELLS = 4      # number of cell lines
    PROTEIN_NUM = 128  # synthetic protein vocabulary

    key = jax.random.PRNGKey(0)
    k_par, k_nbr, k_da, k_dva, k_db, k_dvb, k_cells = jax.random.split(key, 7)

    params = init_params(k_par, input_dim=INPUT_DIM, dv_input_dim=DV_INPUT_DIM,
                         inner_dim=INNER_DIM, protein_num=PROTEIN_NUM, n_hop=N_HOP)

    # Synthetic deterministic cell -> neighbor protein id table
    # (stand-in for DataPPI.get_neighbor_set()).
    neighbor_table = jax.random.randint(
        k_nbr, (NUM_CELLS, N_HOP, N_MEMORY), 0, PROTEIN_NUM, dtype=jnp.int32)

    drug_a = jax.random.normal(k_da, (B, INPUT_DIM), jnp.float32)
    dv_drug_a = jax.random.normal(k_dva, (B, DV_INPUT_DIM), jnp.float32)
    drug_b = jax.random.normal(k_db, (B, INPUT_DIM), jnp.float32)
    dv_drug_b = jax.random.normal(k_dvb, (B, DV_INPUT_DIM), jnp.float32)
    cells = jax.random.randint(k_cells, (B, 1), 0, NUM_CELLS, dtype=jnp.int32)

    out = binary_class_dv_ppi_mlp_head(drug_a, dv_drug_a, drug_b, dv_drug_b,
                                       cells, neighbor_table, params)
    out = jax.block_until_ready(out)
    assert out.shape == (B, 1) and out.dtype == jnp.float32

    ref = _reference(drug_a, dv_drug_a, drug_b, dv_drug_b, cells,
                     neighbor_table, params)
    # Slightly relaxed tolerance: the mix->fc1 weight fusion reassociates the
    # float32 sums relative to the unfused reference.
    assert jnp.allclose(out, ref, atol=2e-3, rtol=2e-3), "kernel != reference"
    print("KERNEL_OK")
</pallas_src>

<mosaic_0001>
module attributes {stable_mosaic.version = 11 : i64} {
  func.func @_head_kernel(%arg0: i32, %arg1: memref<8x16x32xf32, #tpu.memory_space<vmem>>, %arg2: memref<8x16x32xf32, #tpu.memory_space<vmem>>, %arg3: memref<8x128xf32, #tpu.memory_space<vmem>>, %arg4: memref<8x64xf32, #tpu.memory_space<vmem>>, %arg5: memref<32x32xf32, #tpu.memory_space<vmem>>, %arg6: memref<32x32xf32, #tpu.memory_space<vmem>>, %arg7: memref<32x32xf32, #tpu.memory_space<vmem>>, %arg8: memref<32x32xf32, #tpu.memory_space<vmem>>, %arg9: memref<128x64xf32, #tpu.memory_space<vmem>>, %arg10: memref<64x64xf32, #tpu.memory_space<vmem>>, %arg11: memref<32x64xf32, #tpu.memory_space<vmem>>, %arg12: memref<64x32xf32, #tpu.memory_space<vmem>>, %arg13: memref<32x1xf32, #tpu.memory_space<vmem>>, %arg14: memref<4x64xf32, #tpu.memory_space<vmem>>, %arg15: memref<8x1xf32, #tpu.memory_space<vmem>>) attributes {dimension_semantics = [#tpu.dimension_semantics<parallel>], iteration_bounds = array<i64: 1>, scalar_prefetch = 0 : i64, scratch_operands = 0 : i64, tpu.core_type = #tpu.core_type<tc>, window_params = [{transform_indices = @transform_0, window_bounds = array<i64: 8, 16, 32>}, {transform_indices = @transform_1, window_bounds = array<i64: 8, 16, 32>}, {transform_indices = @transform_2, window_bounds = array<i64: 8, 128>}, {transform_indices = @transform_3, window_bounds = array<i64: 8, 64>}, {pipeline_mode = #tpu.pipeline_mode<synchronous>, transform_indices = @transform_4, window_bounds = array<i64: 32, 32>}, {pipeline_mode = #tpu.pipeline_mode<synchronous>, transform_indices = @transform_5, window_bounds = array<i64: 32, 32>}, {pipeline_mode = #tpu.pipeline_mode<synchronous>, transform_indices = @transform_6, window_bounds = array<i64: 32, 32>}, {pipeline_mode = #tpu.pipeline_mode<synchronous>, transform_indices = @transform_7, window_bounds = array<i64: 32, 32>}, {pipeline_mode = #tpu.pipeline_mode<synchronous>, transform_indices = @transform_8, window_bounds = array<i64: 128, 64>}, {pipeline_mode = #tpu.pipeline_mode<synchronous>, transform_indices = @transform_9, window_bounds = array<i64: 64, 64>}, {pipeline_mode = #tpu.pipeline_mode<synchronous>, transform_indices = @transform_10, window_bounds = array<i64: 32, 64>}, {pipeline_mode = #tpu.pipeline_mode<synchronous>, transform_indices = @transform_11, window_bounds = array<i64: 64, 32>}, {pipeline_mode = #tpu.pipeline_mode<synchronous>, transform_indices = @transform_12, window_bounds = array<i64: 32, 1>}, {pipeline_mode = #tpu.pipeline_mode<synchronous>, transform_indices = @transform_13, window_bounds = array<i64: 4, 64>}, {transform_indices = @transform_14, window_bounds = array<i64: 8, 1>}]} {
    %c0 = arith.constant 0 : index
    %c0_0 = arith.constant 0 : index
    %0 = vector.load %arg14[%c0, %c0_0] : memref<4x64xf32, #tpu.memory_space<vmem>>, vector<4x64xf32>
    %1 = vector.extract_strided_slice %0 {offsets = [0, 0], sizes = [1, 32], strides = [1, 1]} : vector<4x64xf32> to vector<1x32xf32>
    %2 = vector.extract_strided_slice %0 {offsets = [1, 0], sizes = [1, 64], strides = [1, 1]} : vector<4x64xf32> to vector<1x64xf32>
    %3 = vector.extract_strided_slice %0 {offsets = [2, 0], sizes = [1, 32], strides = [1, 1]} : vector<4x64xf32> to vector<1x32xf32>
    %4 = vector.extract_strided_slice %0 {offsets = [3, 0], sizes = [1, 1], strides = [1, 1]} : vector<4x64xf32> to vector<1x1xf32>
    %c0_1 = arith.constant 0 : index
    %c0_2 = arith.constant 0 : index
    %c0_3 = arith.constant 0 : index
    %5 = vector.load %arg1[%c0_1, %c0_2, %c0_3] : memref<8x16x32xf32, #tpu.memory_space<vmem>>, vector<8x16x32xf32>
    %c0_4 = arith.constant 0 : index
    %c0_5 = arith.constant 0 : index
    %c0_6 = arith.constant 0 : index
    %6 = vector.load %arg2[%c0_4, %c0_5, %c0_6] : memref<8x16x32xf32, #tpu.memory_space<vmem>>, vector<8x16x32xf32>
    %cst = arith.constant dense<0.000000e+00> : vector<8x32xf32>
    %7 = vector.multi_reduction <add>, %5, %cst [1] : vector<8x16x32xf32> to vector<8x32xf32>
    %cst_7 = arith.constant dense<0xFF800000> : vector<8x32xf32>
    %8 = vector.multi_reduction <maximumf>, %5, %cst_7 [1] : vector<8x16x32xf32> to vector<8x32xf32>
    %cst_8 = arith.constant dense<0.000000e+00> : vector<8x32xf32>
    %9 = vector.multi_reduction <add>, %6, %cst_8 [1] : vector<8x16x32xf32> to vector<8x32xf32>
    %cst_9 = arith.constant dense<0xFF800000> : vector<8x32xf32>
    %10 = vector.multi_reduction <maximumf>, %6, %cst_9 [1] : vector<8x16x32xf32> to vector<8x32xf32>
    %c0_10 = arith.constant 0 : index
    %c0_11 = arith.constant 0 : index
    %11 = vector.load %arg5[%c0_10, %c0_11] : memref<32x32xf32, #tpu.memory_space<vmem>>, vector<32x32xf32>
    %cst_12 = arith.constant dense<0.000000e+00> : vector<8x32xf32>
    %12 = tpu.matmul %7, %11, %cst_12 {dimension_numbers = #tpu.dot_dimension_numbers<[1], [0], [0], [1], [0, 0, 1, 1], [], []>} : vector<8x32xf32>, vector<32x32xf32>, vector<8x32xf32> -> vector<8x32xf32>
    %c0_13 = arith.constant 0 : index
    %c0_14 = arith.constant 0 : index
    %13 = vector.load %arg6[%c0_13, %c0_14] : memref<32x32xf32, #tpu.memory_space<vmem>>, vector<32x32xf32>
    %cst_15 = arith.constant dense<0.000000e+00> : vector<8x32xf32>
    %14 = tpu.matmul %8, %13, %cst_15 {dimension_numbers = #tpu.dot_dimension_numbers<[1], [0], [0], [1], [0, 0, 1, 1], [], []>} : vector<8x32xf32>, vector<32x32xf32>, vector<8x32xf32> -> vector<8x32xf32>
    %15 = arith.addf %12, %14 : vector<8x32xf32>
    %c0_16 = arith.constant 0 : index
    %c0_17 = arith.constant 0 : index
    %16 = vector.load %arg7[%c0_16, %c0_17] : memref<32x32xf32, #tpu.memory_space<vmem>>, vector<32x32xf32>
    %cst_18 = arith.constant dense<0.000000e+00> : vector<8x32xf32>
    %17 = tpu.matmul %9, %16, %cst_18 {dimension_numbers = #tpu.dot_dimension_numbers<[1], [0], [0], [1], [0, 0, 1, 1], [], []>} : vector<8x32xf32>, vector<32x32xf32>, vector<8x32xf32> -> vector<8x32xf32>
    %18 = arith.addf %15, %17 : vector<8x32xf32>
    %c0_19 = arith.constant 0 : index
    %c0_20 = arith.constant 0 : index
    %19 = vector.load %arg8[%c0_19, %c0_20] : memref<32x32xf32, #tpu.memory_space<vmem>>, vector<32x32xf32>
    %cst_21 = arith.constant dense<0.000000e+00> : vector<8x32xf32>
    %20 = tpu.matmul %10, %19, %cst_21 {dimension_numbers = #tpu.dot_dimension_numbers<[1], [0], [0], [1], [0, 0, 1, 1], [], []>} : vector<8x32xf32>, vector<32x32xf32>, vector<8x32xf32> -> vector<8x32xf32>
    %21 = arith.addf %18, %20 : vector<8x32xf32>
    %22 = vector.broadcast %1 : vector<1x32xf32> to vector<8x32xf32>
    %23 = arith.addf %21, %22 : vector<8x32xf32>
    %c0_22 = arith.constant 0 : index
    %c0_23 = arith.constant 0 : index
    %24 = vector.load %arg3[%c0_22, %c0_23] : memref<8x128xf32, #tpu.memory_space<vmem>>, vector<8x128xf32>
    %c0_24 = arith.constant 0 : index
    %c0_25 = arith.constant 0 : index
    %25 = vector.load %arg9[%c0_24, %c0_25] : memref<128x64xf32, #tpu.memory_space<vmem>>, vector<128x64xf32>
    %cst_26 = arith.constant dense<0.000000e+00> : vector<8x64xf32>
    %26 = tpu.matmul %24, %25, %cst_26 {dimension_numbers = #tpu.dot_dimension_numbers<[1], [0], [0], [1], [0, 0, 1, 1], [], []>} : vector<8x128xf32>, vector<128x64xf32>, vector<8x64xf32> -> vector<8x64xf32>
    %c0_27 = arith.constant 0 : index
    %c0_28 = arith.constant 0 : index
    %27 = vector.load %arg4[%c0_27, %c0_28] : memref<8x64xf32, #tpu.memory_space<vmem>>, vector<8x64xf32>
    %c0_29 = arith.constant 0 : index
    %c0_30 = arith.constant 0 : index
    %28 = vector.load %arg10[%c0_29, %c0_30] : memref<64x64xf32, #tpu.memory_space<vmem>>, vector<64x64xf32>
    %cst_31 = arith.constant dense<0.000000e+00> : vector<8x64xf32>
    %29 = tpu.matmul %27, %28, %cst_31 {dimension_numbers = #tpu.dot_dimension_numbers<[1], [0], [0], [1], [0, 0, 1, 1], [], []>} : vector<8x64xf32>, vector<64x64xf32>, vector<8x64xf32> -> vector<8x64xf32>
    %30 = arith.addf %26, %29 : vector<8x64xf32>
    %c0_32 = arith.constant 0 : index
    %c0_33 = arith.constant 0 : index
    %31 = vector.load %arg11[%c0_32, %c0_33] : memref<32x64xf32, #tpu.memory_space<vmem>>, vector<32x64xf32>
    %cst_34 = arith.constant dense<0.000000e+00> : vector<8x64xf32>
    %32 = tpu.matmul %23, %31, %cst_34 {dimension_numbers = #tpu.dot_dimension_numbers<[1], [0], [0], [1], [0, 0, 1, 1], [], []>} : vector<8x32xf32>, vector<32x64xf32>, vector<8x64xf32> -> vector<8x64xf32>
    %33 = arith.addf %30, %32 : vector<8x64xf32>
    %34 = vector.broadcast %2 : vector<1x64xf32> to vector<8x64xf32>
    %35 = arith.addf %33, %34 : vector<8x64xf32>
    %cst_35 = arith.constant 0.000000e+00 : f32
    %36 = vector.broadcast %cst_35 : f32 to vector<8x64xf32>
    %37 = arith.maximumf %35, %36 : vector<8x64xf32>
    %c0_36 = arith.constant 0 : index
    %c0_37 = arith.constant 0 : index
    %38 = vector.load %arg12[%c0_36, %c0_37] : memref<64x32xf32, #tpu.memory_space<vmem>>, vector<64x32xf32>
    %cst_38 = arith.constant dense<0.000000e+00> : vector<8x32xf32>
    %39 = tpu.matmul %37, %38, %cst_38 {dimension_numbers = #tpu.dot_dimension_numbers<[1], [0], [0], [1], [0, 0, 1, 1], [], []>} : vector<8x64xf32>, vector<64x32xf32>, vector<8x32xf32> -> vector<8x32xf32>
    %40 = vector.broadcast %3 : vector<1x32xf32> to vector<8x32xf32>
    %41 = arith.addf %39, %40 : vector<8x32xf32>
    %cst_39 = arith.constant 0.000000e+00 : f32
    %42 = vector.broadcast %cst_39 : f32 to vector<8x32xf32>
    %43 = arith.maximumf %41, %42 : vector<8x32xf32>
    %c0_40 = arith.constant 0 : index
    %c0_41 = arith.constant 0 : index
    %44 = vector.load %arg13[%c0_40, %c0_41] : memref<32x1xf32, #tpu.memory_space<vmem>>, vector<32x1xf32>
    %cst_42 = arith.constant dense<0.000000e+00> : vector<8x1xf32>
    %45 = tpu.matmul %43, %44, %cst_42 {dimension_numbers = #tpu.dot_dimension_numbers<[1], [0], [0], [1], [0, 0, 1, 1], [], []>} : vector<8x32xf32>, vector<32x1xf32>, vector<8x1xf32> -> vector<8x1xf32>
    %46 = vector.broadcast %4 : vector<1x1xf32> to vector<8x1xf32>
    %47 = arith.addf %45, %46 : vector<8x1xf32>
    %c0_43 = arith.constant 0 : index
    %c0_44 = arith.constant 0 : index
    %48 = vector.load %arg15[%c0_43, %c0_44] : memref<8x1xf32, #tpu.memory_space<vmem>>, vector<8x1xf32>
    tpu.vector_store %arg15[%c0_43, %c0_44], %47 {strides = array<i32>} : memref<8x1xf32, #tpu.memory_space<vmem>>, vector<8x1xf32>,
    return
  }
  func.func @transform_0(%arg0: i32) -> (i32, i32, i32) {
    %c0_i32 = arith.constant 0 : i32
    %c0_i32_0 = arith.constant 0 : i32
    %c0_i32_1 = arith.constant 0 : i32
    return %arg0, %c0_i32, %c0_i32_0 : i32, i32, i32
  }
  func.func @transform_1(%arg0: i32) -> (i32, i32, i32) {
    %c0_i32 = arith.constant 0 : i32
    %c0_i32_0 = arith.constant 0 : i32
    %c0_i32_1 = arith.constant 0 : i32
    return %arg0, %c0_i32, %c0_i32_0 : i32, i32, i32
  }
  func.func @transform_2(%arg0: i32) -> (i32, i32) {
    %c0_i32 = arith.constant 0 : i32
    %c0_i32_0 = arith.constant 0 : i32
    return %arg0, %c0_i32 : i32, i32
  }
  func.func @transform_3(%arg0: i32) -> (i32, i32) {
    %c0_i32 = arith.constant 0 : i32
    %c0_i32_0 = arith.constant 0 : i32
    return %arg0, %c0_i32 : i32, i32
  }
  func.func @transform_4(%arg0: i32) -> (i32, i32) {
    %c0_i32 = arith.constant 0 : i32
    %c0_i32_0 = arith.constant 0 : i32
    %c0_i32_1 = arith.constant 0 : i32
    return %c0_i32, %c0_i32_0 : i32, i32
  }
  func.func @transform_5(%arg0: i32) -> (i32, i32) {
    %c0_i32 = arith.constant 0 : i32
    %c0_i32_0 = arith.constant 0 : i32
    %c0_i32_1 = arith.constant 0 : i32
    return %c0_i32, %c0_i32_0 : i32, i32
  }
  func.func @transform_6(%arg0: i32) -> (i32, i32) {
    %c0_i32 = arith.constant 0 : i32
    %c0_i32_0 = arith.constant 0 : i32
    %c0_i32_1 = arith.constant 0 : i32
    return %c0_i32, %c0_i32_0 : i32, i32
  }
  func.func @transform_7(%arg0: i32) -> (i32, i32) {
    %c0_i32 = arith.constant 0 : i32
    %c0_i32_0 = arith.constant 0 : i32
    %c0_i32_1 = arith.constant 0 : i32
    return %c0_i32, %c0_i32_0 : i32, i32
  }
  func.func @transform_8(%arg0: i32) -> (i32, i32) {
    %c0_i32 = arith.constant 0 : i32
    %c0_i32_0 = arith.constant 0 : i32
    %c0_i32_1 = arith.constant 0 : i32
    return %c0_i32, %c0_i32_0 : i32, i32
  }
  func.func @transform_9(%arg0: i32) -> (i32, i32) {
    %c0_i32 = arith.constant 0 : i32
    %c0_i32_0 = arith.constant 0 : i32
    %c0_i32_1 = arith.constant 0 : i32
    return %c0_i32, %c0_i32_0 : i32, i32
  }
  func.func @transform_10(%arg0: i32) -> (i32, i32) {
    %c0_i32 = arith.constant 0 : i32
    %c0_i32_0 = arith.constant 0 : i32
    %c0_i32_1 = arith.constant 0 : i32
    return %c0_i32, %c0_i32_0 : i32, i32
  }
  func.func @transform_11(%arg0: i32) -> (i32, i32) {
    %c0_i32 = arith.constant 0 : i32
    %c0_i32_0 = arith.constant 0 : i32
    %c0_i32_1 = arith.constant 0 : i32
    return %c0_i32, %c0_i32_0 : i32, i32
  }
  func.func @transform_12(%arg0: i32) -> (i32, i32) {
    %c0_i32 = arith.constant 0 : i32
    %c0_i32_0 = arith.constant 0 : i32
    %c0_i32_1 = arith.constant 0 : i32
    return %c0_i32, %c0_i32_0 : i32, i32
  }
  func.func @transform_13(%arg0: i32) -> (i32, i32) {
    %c0_i32 = arith.constant 0 : i32
    %c0_i32_0 = arith.constant 0 : i32
    %c0_i32_1 = arith.constant 0 : i32
    return %c0_i32, %c0_i32_0 : i32, i32
  }
  func.func @transform_14(%arg0: i32) -> (i32, i32) {
    %c0_i32 = arith.constant 0 : i32
    %c0_i32_0 = arith.constant 0 : i32
    return %arg0, %c0_i32 : i32, i32
  }
}

</mosaic_0001>

<bundles_post_ra>
// kernel: tpu_custom_call.1
= control target key start
LH: loop header
LB: loop body
LE: loop exit
PB: predicated region body
PF: predicated region fallthrough
CT: control target
= control target key end

     0   :  { %19 = vsyncpa [#allocation3], 0  ;;  %s2458_s0 = inlined_call_operand.vmem [shape: f32[8,16,32], index: 0, kind: input, shape index: {}]   ;;  %s2459_s1 = inlined_call_operand.vmem [shape: f32[8,16,32], index: 1, kind: input, shape index: {}]   ;;  %s2460_s2 = inlined_call_operand.hbm [shape: f32[8,128], index: 2, kind: input, shape index: {}]   ;;  %s2461_s3 = inlined_call_operand.hbm [shape: f32[8,64], index: 3, kind: input, shape index: {}]   ;;  %s2462_s4 = inlined_call_operand.hbm [shape: f32[32,32], index: 4, kind: input, shape index: {}]   ;;  %s2463_s5 = inlined_call_operand.hbm [shape: f32[32,32], index: 5, kind: input, shape index: {}]   ;;  %s2464_s6 = inlined_call_operand.hbm [shape: f32[32,32], index: 6, kind: input, shape index: {}]   ;;  %s2465_s7 = inlined_call_operand.hbm [shape: f32[32,32], index: 7, kind: input, shape index: {}]   ;;  %s2466_s8 = inlined_call_operand.vmem [shape: f32[128,64], index: 8, kind: input, shape index: {}]   ;;  %s2467_s9 = inlined_call_operand.hbm [shape: f32[64,64], index: 9, kind: input, shape index: {}]   ;;  %s2468_s10 = inlined_call_operand.hbm [shape: f32[32,64], index: 10, kind: input, shape index: {}]   ;;  %s2469_s11 = inlined_call_operand.vmem [shape: f32[64,32], index: 11, kind: input, shape index: {}]   ;;  %s2470_s12 = inlined_call_operand.vmem [shape: f32[32,1], index: 12, kind: input, shape index: {}]   ;;  %s2471_s13 = inlined_call_operand.vmem [shape: f32[4,64], index: 13, kind: input, shape index: {}]   ;;  %s2472_s14 = inlined_call_operand.vmem [shape: f32[8,1], index: 14, kind: output, shape index: {}]  }
   0x1   :  { %20 = vsyncpa [#allocation5], 0 }
   0x2   :  { %21 = vsyncpa [#allocation8], 0 }
   0x3   :  { %22 = vsyncpa [#allocation11], 0 }
   0x4   :  { %23 = vsyncpa [#allocation14], 0  ;;  %s1779_s29 = smov [#allocation4]   ;;  %s1593_s17 = scalar_lea.hbm %s2461_s3, 128 }
   0x5   :  { %s44_s30 = sshll.u32 %s1779_s29, 4  ;;  %p1594_p0 = scmp.ne.s32.totalorder %s2461_s3, %s1593_s17  ;;  %s45_s30 = int_to_ptr.vmem [resolvable:$true] %s44_s30 }
   0x6   :  { %p1597_p1 = scmp.lt.u32.totalorder %s1593_s17, %s2461_s3 }
   0x8   :  { %p1599_p2 = pnand %p1597_p1, %p1594_p0 }
   0xa   :  { %1602 = shalt.err (!%p1599_p2)
}
   0xb   :  { %s1603_s22 = scalar_lea.vmem %s45_s30, 128  ;;  %p1608_p4 = scmp.lt.s32.totalorder %s45_s30, %s45_s30 }
   0xc   :  { %p1604_p3 = scmp.ne.s32.totalorder %s45_s30, %s1603_s22  ;;  %p1609_p5 = scmp.lt.s32.totalorder %s1603_s22, %s1603_s22 }
   0xe   :  { %p1610_p6 = por %p1609_p5, %p1608_p4 }
  0x10   :  { %p1611_p7 = pnand %p1610_p6, %p1604_p3 }
  0x12   :  { %1614 = shalt.err (!%p1611_p7)
}
  0x13   :  { %47 = dma.hbm_to_vmem [thread:$0]  %s2461_s3, 128, %s45_s30, [#allocation5]  }
  0x14   :  { %s1780_s25 = smov [#allocation7]   ;;  %s1781_s27 = smov [#allocation10]  }
  0x15   :  { %s65_s26 = sshll.u32 %s1780_s25, 4  ;;  %s89_s28 = sshll.u32 %s1781_s27, 4  ;;  %s66_s26 = int_to_ptr.vmem [resolvable:$true] %s65_s26  ;;  %s90_s28 = int_to_ptr.vmem [resolvable:$true] %s89_s28 }
  0x16   :  { %s1615_s16 = scalar_lea.hbm %s2463_s5, 512 }
  0x17   :  { %p1616_p8 = scmp.ne.s32.totalorder %s2463_s5, %s1615_s16  ;;  %p1619_p9 = scmp.lt.u32.totalorder %s1615_s16, %s2463_s5 }
  0x19   :  { %p1621_p10 = pnand %p1619_p9, %p1616_p8 }
  0x1b   :  { %1624 = shalt.err (!%p1621_p10)
}
  0x1c   :  { %s1625_s3 = scalar_lea.vmem %s66_s26, 512  ;;  %p1630_p12 = scmp.lt.s32.totalorder %s66_s26, %s66_s26 }
  0x1d   :  { %p1626_p11 = scmp.ne.s32.totalorder %s66_s26, %s1625_s3  ;;  %p1631_p13 = scmp.lt.s32.totalorder %s1625_s3, %s1625_s3 }
  0x1f   :  { %p1632_p0 = por %p1631_p13, %p1630_p12 }
  0x21   :  { %p1633_p1 = pnand %p1632_p0, %p1626_p11 }
  0x23   :  { %1636 = shalt.err (!%p1633_p1)
}
  0x24   :  { %s1782_s30 = smov 128   ;;  %s1783_s21 = smov 8  }
  0x25   :  { %71 = dma.hbm_to_vmem [thread:$0]  %s2463_s5, 512, %s66_s26, [#allocation8], %s1782_s30, %s1782_s30, %s1783_s21  }
  0x26   :  { %s1637_s27 = scalar_lea.hbm %s2465_s7, 512 }
  0x27   :  { %p1638_p2 = scmp.ne.s32.totalorder %s2465_s7, %s1637_s27  ;;  %p1641_p3 = scmp.lt.u32.totalorder %s1637_s27, %s2465_s7 }
  0x29   :  { %p1643_p4 = pnand %p1641_p3, %p1638_p2 }
  0x2b   :  { %1646 = shalt.err (!%p1643_p4)
}
  0x2c   :  { %s1647_s18 = scalar_lea.vmem %s90_s28, 512  ;;  %p1652_p6 = scmp.lt.s32.totalorder %s90_s28, %s90_s28 }
  0x2d   :  { %p1648_p5 = scmp.ne.s32.totalorder %s90_s28, %s1647_s18  ;;  %p1653_p7 = scmp.lt.s32.totalorder %s1647_s18, %s1647_s18 }
  0x2f   :  { %p1654_p8 = por %p1653_p7, %p1652_p6 }
  0x31   :  { %p1655_p9 = pnand %p1654_p8, %p1648_p5 }
  0x33   :  { %1658 = shalt.err (!%p1655_p9)
}
  0x34   :  { %95 = dma.hbm_to_vmem [thread:$0]  %s2465_s7, 512, %s90_s28, [#allocation11], %s1782_s30, %s1782_s30, %s1783_s21  }
  0x35   :  { %s1784_s19 = smov [#allocation2]   ;;  %s1785_s3 = smov [#allocation6]  }
  0x36   :  { %s34_s20 = sshll.u32 %s1784_s19, 4  ;;  %s53_s22 = sshll.u32 %s1785_s3, 4  ;;  %s35_s20 = int_to_ptr.vmem [resolvable:$true] %s34_s20  ;;  %s54_s22 = int_to_ptr.vmem [resolvable:$true] %s53_s22 }
  0x37   :  { %s1659_s25 = scalar_lea.hbm %s2460_s2, 128 }
  0x38   :  { %p1660_p10 = scmp.ne.s32.totalorder %s2460_s2, %s1659_s25  ;;  %p1663_p11 = scmp.lt.u32.totalorder %s1659_s25, %s2460_s2 }
  0x3a   :  { %p1665_p12 = pnand %p1663_p11, %p1660_p10 }
  0x3c   :  { %1668 = shalt.err (!%p1665_p12)
}
  0x3d   :  { %s1669_s7 = scalar_lea.vmem %s35_s20, 128  ;;  %p1674_p0 = scmp.lt.s32.totalorder %s35_s20, %s35_s20 }
  0x3e   :  { %p1670_p13 = scmp.ne.s32.totalorder %s35_s20, %s1669_s7  ;;  %p1675_p1 = scmp.lt.s32.totalorder %s1669_s7, %s1669_s7 }
  0x40   :  { %p1676_p2 = por %p1675_p1, %p1674_p0 }
  0x42   :  { %p1677_p3 = pnand %p1676_p2, %p1670_p13 }
  0x44   :  { %1680 = shalt.err (!%p1677_p3)
}
  0x45   :  { %37 = dma.hbm_to_vmem [thread:$0]  %s2460_s2, 128, %s35_s20, [#allocation3]  }
  0x46   :  { %s1681_s26 = scalar_lea.hbm %s2462_s4, 512 }
  0x47   :  { %p1682_p4 = scmp.ne.s32.totalorder %s2462_s4, %s1681_s26  ;;  %p1685_p5 = scmp.lt.u32.totalorder %s1681_s26, %s2462_s4 }
  0x49   :  { %p1687_p6 = pnand %p1685_p5, %p1682_p4 }
  0x4b   :  { %1690 = shalt.err (!%p1687_p6)
}
  0x4c   :  { %s1691_s25 = scalar_lea.vmem %s54_s22, 512  ;;  %p1696_p8 = scmp.lt.s32.totalorder %s54_s22, %s54_s22 }
  0x4d   :  { %p1692_p7 = scmp.ne.s32.totalorder %s54_s22, %s1691_s25  ;;  %p1697_p9 = scmp.lt.s32.totalorder %s1691_s25, %s1691_s25 }
  0x4f   :  { %p1698_p10 = por %p1697_p9, %p1696_p8 }
  0x51   :  { %p1699_p11 = pnand %p1698_p10, %p1692_p7 }
  0x53   :  { %1702 = shalt.err (!%p1699_p11)
}
  0x54   :  { %59 = dma.hbm_to_vmem [thread:$0]  %s2462_s4, 512, %s54_s22, [#allocation5], %s1782_s30, %s1782_s30, %s1783_s21  }
  0x55   :  { %s1786_s27 = smov [#allocation9]   ;;  %s1787_s15 = smov [#allocation12]  }
  0x56   :  { %s77_s29 = sshll.u32 %s1786_s27, 4  ;;  %s103_s16 = sshll.u32 %s1787_s15, 4  ;;  %s78_s29 = int_to_ptr.vmem [resolvable:$true] %s77_s29  ;;  %s104_s16 = int_to_ptr.vmem [resolvable:$true] %s103_s16 }
  0x57   :  { %s1703_s17 = scalar_lea.hbm %s2464_s6, 512 }
  0x58   :  { %p1704_p12 = scmp.ne.s32.totalorder %s2464_s6, %s1703_s17  ;;  %p1707_p13 = scmp.lt.u32.totalorder %s1703_s17, %s2464_s6 }
  0x5a   :  { %p1709_p0 = pnand %p1707_p13, %p1704_p12 }
  0x5c   :  { %1712 = shalt.err (!%p1709_p0)
}
  0x5d   :  { %s1713_s4 = scalar_lea.vmem %s78_s29, 512  ;;  %p1718_p2 = scmp.lt.s32.totalorder %s78_s29, %s78_s29 }
  0x5e   :  { %p1714_p1 = scmp.ne.s32.totalorder %s78_s29, %s1713_s4  ;;  %p1719_p3 = scmp.lt.s32.totalorder %s1713_s4, %s1713_s4 }
  0x60   :  { %p1720_p4 = por %p1719_p3, %p1718_p2 }
  0x62   :  { %p1721_p5 = pnand %p1720_p4, %p1714_p1 }
  0x64   :  { %1724 = shalt.err (!%p1721_p5)
}
  0x65   :  { %83 = dma.hbm_to_vmem [thread:$0]  %s2464_s6, 512, %s78_s29, [#allocation8], %s1782_s30, %s1782_s30, %s1783_s21  }
  0x66   :  { %s1725_s25 = scalar_lea.hbm %s2467_s9, 1024 }
  0x67   :  { %p1726_p6 = scmp.ne.s32.totalorder %s2467_s9, %s1725_s25  ;;  %p1729_p7 = scmp.lt.u32.totalorder %s1725_s25, %s2467_s9 }
  0x69   :  { %p1731_p8 = pnand %p1729_p7, %p1726_p6 }
  0x6b   :  { %1734 = shalt.err (!%p1731_p8)
}
  0x6c   :  { %s1735_s7 = scalar_lea.vmem %s104_s16, 1024  ;;  %p1740_p10 = scmp.lt.s32.totalorder %s104_s16, %s104_s16 }
  0x6d   :  { %p1736_p9 = scmp.ne.s32.totalorder %s104_s16, %s1735_s7  ;;  %p1741_p11 = scmp.lt.s32.totalorder %s1735_s7, %s1735_s7 }
  0x6f   :  { %p1742_p12 = por %p1741_p11, %p1740_p10 }
  0x71   :  { %p1743_p13 = pnand %p1742_p12, %p1736_p9 }
  0x73   :  { %1746 = shalt.err (!%p1743_p13)
}
  0x74   :  { %109 = dma.hbm_to_vmem [thread:$0]  %s2467_s9, 1024, %s104_s16, [#allocation11], %s1782_s30, %s1782_s30, %s1783_s21  }
  0x75   :  { %s1788_s28 = smov [#allocation13]   ;;  %s1747_s26 = scalar_lea.hbm %s2468_s10, 512 }
  0x76   :  { %s115_s17 = sshll.u32 %s1788_s28, 4  ;;  %p1748_p0 = scmp.ne.s32.totalorder %s2468_s10, %s1747_s26  ;;  %s116_s17 = int_to_ptr.vmem [resolvable:$true] %s115_s17 }
  0x77   :  { %p1751_p1 = scmp.lt.u32.totalorder %s1747_s26, %s2468_s10 }
  0x79   :  { %p1753_p2 = pnand %p1751_p1, %p1748_p0 }
  0x7b   :  { %1756 = shalt.err (!%p1753_p2)
}
  0x7c   :  { %s1757_s23 = scalar_lea.vmem %s116_s17, 512  ;;  %p1762_p4 = scmp.lt.s32.totalorder %s116_s17, %s116_s17 }
  0x7d   :  { %p1758_p3 = scmp.ne.s32.totalorder %s116_s17, %s1757_s23  ;;  %p1763_p5 = scmp.lt.s32.totalorder %s1757_s23, %s1757_s23 }
  0x7f   :  { %p1764_p6 = por %p1763_p5, %p1762_p4 }
  0x81   :  { %p1765_p7 = pnand %p1764_p6, %p1758_p3 }
  0x83   :  { %1768 = shalt.err (!%p1765_p7)
}
  0x84   :  { %121 = dma.hbm_to_vmem [thread:$0]  %s2468_s10, 512, %s116_s17, [#allocation14], %s1782_s30, %s1782_s30, %s1783_s21  }
  0x85   :  { %1769 = dma.done.wait [#allocation3], 128  }
  0x86   :  { %1770 = vsyncadd [#allocation3], 4294967168 }
  0x87   :  { %1771 = dma.done.wait [#allocation5], 640  }
  0x88   :  { %1772 = vsyncadd [#allocation5], 4294966656 }
  0x89   :  { %1773 = dma.done.wait [#allocation8], 1024  }
  0x8a   :  { %1774 = vsyncadd [#allocation8], 4294966272 }
  0x8b   :  { %1775 = dma.done.wait [#allocation11], 1536  }
  0x8c   :  { %1776 = vsyncadd [#allocation11], 4294965760 }
  0x8d   :  { %1777 = dma.done.wait [#allocation14], 512  }
  0x8e   :  { %1778 = vsyncadd [#allocation14], 4294966784  ;;  %v1789_v0 = vmov 0.0|0.0   ;;  %vm1790_vm0 = vmmov 0   ;;  %v1791_v1 = vmov 0.0   ;;  %v478_v2 = vld [vmem:[#allocation7] sm:$0xff] }
  0x8f   :  { %1496 = vmatprep.subr.bf16.mxu0 %v1789_v0  ;;  %1502 = vmatprep.subr.bf16.mxu1 %v1789_v0  ;;  %v479_v3 = vld [vmem:[#allocation7 + $0x8] sm:$0xff]  ;;  %v474_v4 = vld [vmem:[#allocation6] sm:$0xff]  ;;  %vm185_vm1 = vcmask 261120   ;;  %v480_v7 = vld [vmem:[#allocation7 + $0x10] sm:$0xff]  ;;  %vm490_vm2 = vcmask 1041409   ;;  %vm492_vm3 = vcmask 1042434  }
  0x90   :  { %1365 = vmatprep.mubr.msk.f32.mxu0 %vm1790_vm0, %v1791_v1  ;;  %1376 = vmatprep.mubr.msk.f32.mxu1 %vm1790_vm0, %v1791_v1  ;;  %v1497_v5 = vpack.c.bf16 %v479_v3, %v478_v2  ;;  %v475_v6 = vld [vmem:[#allocation6 + $0x8] sm:$0xff]  ;;  %v481_v8 = vld [vmem:[#allocation7 + $0x18] sm:$0xff]  ;;  %v476_v10 = vld [vmem:[#allocation6 + $0x10] sm:$0xff]  ;;  %vm494_vm4 = vcmask 1043459   ;;  %vm496_vm5 = vcmask 1044484   ;;  %vm498_vm6 = vcmask 1045509  }
  0x91   :  { %v1503_v9 = vpack.c.bf16 %v475_v6, %v474_v4  ;;  %v477_v11 = vld [vmem:[#allocation6 + $0x18] sm:$0xff]  ;;  %v153_v12 = vld [vmem:[%s2458_s0] sm:$0xff]  ;;  %v1500_v13 = vpack.c.bf16 %v481_v8, %v480_v7  ;;  %v1998_v15 = vld [vmem:[%s2458_s0 + $0x10] sm:$0xff]  ;;  %vm500_vm7 = vcmask 1046534   ;;  %vm502_vm8 = vcmask 1047559  }
  0x92   :  { %1498 = vmatpush3.bf16.msra.mxu0 %v1497_v5  ;;  %v1993_v14 = vld [vmem:[%s2458_s0 + $0x8] sm:$0xff]  ;;  %v2003_v16 = vld [vmem:[%s2458_s0 + $0x18] sm:$0xff]  ;;  %v258_v17 = vsel %vm185_vm1, %v153_v12, -inf  ;;  %v2007_v18 = vsel %vm185_vm1, %v153_v12, 0.0  ;;  %v1506_v19 = vpack.c.bf16 %v477_v11, %v476_v10  ;;  %v2013_v20 = vld [vmem:[%s2458_s0 + $0x20] sm:$0xff]  ;;  %v267_v24 = vsel %vm185_vm1, %v1998_v15, -inf }
  0x93   :  { %1504 = vmatpush3.bf16.msra.mxu1 %v1503_v9  ;;  %1499 = vmatprep.subr.bf16.mxu0 %v1789_v0  ;;  %v2018_v21 = vld [vmem:[%s2458_s0 + $0x28] sm:$0xff]  ;;  %v2023_v22 = vld [vmem:[%s2458_s0 + $0x30] sm:$0xff]  ;;  %v259_v23 = vsel %vm185_vm1, %v1993_v14, -inf  ;;  %v268_v25 = vsel %vm185_vm1, %v2003_v16, -inf  ;;  %v2035_v26 = vld [vmem:[%s2458_s0 + $0x38] sm:$0xff]  ;;  %v276_v31 = vsel %vm185_vm1, %v2013_v20, -inf }
  0x94   :  { %1505 = vmatprep.subr.bf16.mxu1 %v1789_v0  ;;  %v2040_v27 = vld [vmem:[%s2458_s0 + $0x40] sm:$0xff]  ;;  %v2045_v28 = vld [vmem:[%s2458_s0 + $0x48] sm:$0xff]  ;;  %v260_v29 = vmax.f32 %v258_v17, %v259_v23  ;;  %v269_v30 = vmax.f32 %v267_v24, %v268_v25  ;;  %v277_v32 = vsel %vm185_vm1, %v2018_v21, -inf  ;;  %v2054_v33 = vld [vmem:[%s2458_s0 + $0x50] sm:$0xff]  ;;  %v285_v36 = vsel %vm185_vm1, %v2023_v22, -inf }
  0x95   :  { %v2059_v34 = vld [vmem:[%s2458_s0 + $0x58] sm:$0xff]  ;;  %v278_v35 = vmax.f32 %v276_v31, %v277_v32  ;;  %v286_v37 = vsel %vm185_vm1, %v2035_v26, -inf  ;;  %v294_v38 = vsel %vm185_vm1, %v2040_v27, -inf  ;;  %v2070_v39 = vld [vmem:[%s2458_s0 + $0x60] sm:$0xff]  ;;  %v2075_v40 = vld [vmem:[%s2458_s0 + $0x68] sm:$0xff]  ;;  %v295_v44 = vsel %vm185_vm1, %v2045_v28, -inf }
  0x96   :  { %1501 = vmatpush3.bf16.msra.mxu0 %v1500_v13  ;;  %v261_v41 = vrot.slane %v260_v29, 4  ;;  %v270_v42 = vrot.slane %v269_v30, 4  ;;  %v287_v43 = vmax.f32 %v285_v36, %v286_v37  ;;  %v296_v46 = vmax.f32 %v294_v38, %v295_v44  ;;  %v2087_v49 = vld [vmem:[%s2458_s0 + $0x70] sm:$0xff]  ;;  %v2097_v58 = vld [vmem:[%s2458_s0 + $0x78] sm:$0xff] }
  0x97   :  { %1507 = vmatpush3.bf16.msra.mxu1 %v1506_v19  ;;  %1508 = vmatprep.subr.bf16.mxu0 %v1789_v0  ;;  %v279_v45 = vrot.slane %v278_v35, 4  ;;  %v303_v47 = vsel %vm185_vm1, %v2054_v33, -inf  ;;  %v304_v48 = vsel %vm185_vm1, %v2059_v34, -inf  ;;  %v312_v56 = vsel %vm185_vm1, %v2070_v39, -inf }
  0x98   :  { %v262_v50 = vmax.f32 %v260_v29, %v261_v41  ;;  %v271_v51 = vmax.f32 %v269_v30, %v270_v42  ;;  %v288_v52 = vrot.slane %v287_v43, 4  ;;  %v305_v53 = vmax.f32 %v303_v47, %v304_v48  ;;  %1514 = vmatprep.subr.bf16.mxu1 %v1789_v0 }
  0x99   :  { %v280_v54 = vmax.f32 %v278_v35, %v279_v45  ;;  %v297_v55 = vrot.slane %v296_v46, 4  ;;  %v313_v57 = vsel %vm185_vm1, %v2075_v40, -inf  ;;  %v321_v4 = vsel %vm185_vm1, %v2087_v49, -inf }
  0x9a   :  { %v263_v59 = vrot.slane %v262_v50, 2  ;;  %v272_v60 = vrot.slane %v271_v51, 2  ;;  %v289_v61 = vmax.f32 %v287_v43, %v288_v52  ;;  %v306_v62 = vrot.slane %v305_v53, 4 }
  0x9b   :  { %v281_v63 = vrot.slane %v280_v54, 2  ;;  %v298_v2 = vmax.f32 %v296_v46, %v297_v55  ;;  %v314_v3 = vmax.f32 %v312_v56, %v313_v57  ;;  %v322_v12 = vsel %vm185_vm1, %v2097_v58, -inf }
  0x9c   :  { %v264_v5 = vmax.f32 %v262_v50, %v263_v59  ;;  %v273_v6 = vmax.f32 %v271_v51, %v272_v60  ;;  %v290_v7 = vrot.slane %v289_v61, 2  ;;  %v307_v8 = vmax.f32 %v305_v53, %v306_v62 }
  0x9d   :  { %v282_v9 = vmax.f32 %v280_v54, %v281_v63  ;;  %v299_v10 = vrot.slane %v298_v2, 2  ;;  %v315_v11 = vrot.slane %v314_v3, 4  ;;  %v323_v30 = vmax.f32 %v321_v4, %v322_v12 }
  0x9e   :  { %v265_v13 = vrot.slane %v264_v5, 1  ;;  %v274_v17 = vrot.slane %v273_v6, 1  ;;  %v291_v19 = vmax.f32 %v289_v61, %v290_v7  ;;  %v308_v23 = vrot.slane %v307_v8, 2 }
  0x9f   :  { %v283_v24 = vrot.slane %v282_v9, 1  ;;  %v300_v25 = vmax.f32 %v298_v2, %v299_v10  ;;  %v316_v29 = vmax.f32 %v314_v3, %v315_v11  ;;  %v324_v42 = vrot.slane %v323_v30, 4 }
  0xa0   :  { %v266_v31 = vmax.f32 %v264_v5, %v265_v13  ;;  %v275_v32 = vmax.f32 %v273_v6, %v274_v17  ;;  %v292_v35 = vrot.slane %v291_v19, 1  ;;  %v309_v36 = vmax.f32 %v307_v8, %v308_v23 }
  0xa1   :  { %v284_v37 = vmax.f32 %v282_v9, %v283_v24  ;;  %v301_v38 = vrot.slane %v300_v25, 1  ;;  %v317_v41 = vrot.slane %v316_v29, 2  ;;  %v187_v46 = vsel %vm185_vm1, %v1993_v14, 0.0 }
  0xa2   :  { %v293_v43 = vmax.f32 %v291_v19, %v292_v35  ;;  %v310_v44 = vrot.slane %v309_v36, 1  ;;  %v491_v45 = vsel %vm490_vm2, %v275_v32, %v266_v31  ;;  %v325_v50 = vmax.f32 %v323_v30, %v324_v42 }
  0xa3   :  { %v302_v47 = vmax.f32 %v300_v25, %v301_v38  ;;  %v318_v48 = vmax.f32 %v316_v29, %v317_v41  ;;  %v493_v51 = vsel %vm492_vm3, %v284_v37, %v491_v45  ;;  %v188_v54 = vadd.f32 %v187_v46, %v2007_v18 }
  0xa4   :  { %v311_v52 = vmax.f32 %v309_v36, %v310_v44  ;;  %v495_v53 = vsel %vm494_vm4, %v293_v43, %v493_v51  ;;  %v195_v55 = vsel %vm185_vm1, %v1998_v15, 0.0  ;;  %v326_v57 = vrot.slane %v325_v50, 2 }
  0xa5   :  { %v319_v56 = vrot.slane %v318_v48, 1  ;;  %v497_v59 = vsel %vm496_vm5, %v302_v47, %v495_v53  ;;  %v196_v14 = vsel %vm185_vm1, %v2003_v16, 0.0  ;;  %v189_v61 = vrot.slane %v188_v54, 4 }
  0xa6   :  { %v499_v60 = vsel %vm498_vm6, %v311_v52, %v497_v59  ;;  %v197_v62 = vadd.f32 %v196_v14, %v195_v55  ;;  %v204_v63 = vsel %vm185_vm1, %v2013_v20, 0.0  ;;  %v327_v3 = vmax.f32 %v325_v50, %v326_v57  ;;  %v664_v50 = vld [vmem:[#allocation9 + $0x8] sm:$0xff] }
  0xa7   :  { %v320_v2 = vmax.f32 %v318_v48, %v319_v56  ;;  %v205_v18 = vsel %vm185_vm1, %v2018_v21, 0.0  ;;  %v213_v15 = vsel %vm185_vm1, %v2023_v22, 0.0  ;;  %v190_v4 = vadd.f32 %v189_v61, %v188_v54  ;;  %v2144_v54 = vld [vmem:[#allocation10] sm:$0xff]  ;;  %v2146_v14 = vld [vmem:[#allocation10 + $0x8] sm:$0xff]  ;;  %v666_v61 = vld [vmem:[#allocation9 + $0x18] sm:$0xff] }
  0xa8   :  { %v198_v5 = vrot.slane %v197_v62, 4  ;;  %v206_v6 = vadd.f32 %v205_v18, %v204_v63  ;;  %v214_v16 = vsel %vm185_vm1, %v2035_v26, 0.0  ;;  %v328_v7 = vrot.slane %v327_v3, 1 }
  0xa9   :  { %v501_v8 = vsel %vm500_vm7, %v320_v2, %v499_v60  ;;  %v215_v9 = vadd.f32 %v214_v16, %v213_v15  ;;  %v222_v20 = vsel %vm185_vm1, %v2040_v27, 0.0  ;;  %v191_v10 = vrot.slane %v190_v4, 2  ;;  %v665_v60 = vld [vmem:[#allocation9 + $0x10] sm:$0xff]  ;;  %v2161_v16 = vld [vmem:[%s2459_s1 + $0x8] sm:$0xff] }
  0xaa   :  { %v199_v11 = vadd.f32 %v198_v5, %v197_v62  ;;  %v207_v12 = vrot.slane %v206_v6, 4  ;;  %v223_v21 = vsel %vm185_vm1, %v2045_v28, 0.0  ;;  %v329_v22 = vmax.f32 %v327_v3, %v328_v7  ;;  %v2149_v3 = vld [vmem:[#allocation10 + $0x10] sm:$0xff]  ;;  %v2151_v5 = vld [vmem:[#allocation10 + $0x18] sm:$0xff] }
  0xab   :  { %v216_v13 = vrot.slane %v215_v9, 4  ;;  %v224_v17 = vadd.f32 %v223_v21, %v222_v20  ;;  %v231_v19 = vsel %vm185_vm1, %v2054_v33, 0.0  ;;  %v192_v26 = vadd.f32 %v191_v10, %v190_v4 }
  0xac   :  { %v200_v23 = vrot.slane %v199_v11, 2  ;;  %v208_v24 = vadd.f32 %v207_v12, %v206_v6  ;;  %v232_v25 = vsel %vm185_vm1, %v2059_v34, 0.0  ;;  %v503_v27 = vsel %vm502_vm8, %v329_v22, %v501_v8  ;;  %v2156_v6 = vld [vmem:[%s2459_s1] sm:$0xff]  ;;  %v2171_v22 = vld [vmem:[%s2459_s1 + $0x10] sm:$0xff] }
  0xad   :  { %v217_v29 = vadd.f32 %v216_v13, %v215_v9  ;;  %v225_v30 = vrot.slane %v224_v17, 4  ;;  %v233_v31 = vadd.f32 %v232_v25, %v231_v19  ;;  %1366 = vmatmul.mubr.msk.f32.vlgmr.msra.gmra.mrb[0].mxu0 %vm185_vm1, %v503_v27  ;;  %v193_v28 = vrot.slane %v192_v26, 1  ;;  %v2176_v13 = vld [vmem:[%s2459_s1 + $0x18] sm:$0xff] }
  0xae   :  { %v201_v32 = vadd.f32 %v200_v23, %v199_v11  ;;  %v209_v35 = vrot.slane %v208_v24, 2  ;;  %v240_v36 = vsel %vm185_vm1, %v2070_v39, 0.0  ;;  %v241_v41 = vsel %vm185_vm1, %v2075_v40, 0.0  ;;  %1387 = vmatprep.mubr.msk.f32.mxu0 %vm1790_vm0, %v1791_v1  ;;  %v663_v39 = vld [vmem:[#allocation9] sm:$0xff] }
  0xaf   :  { %v218_v33 = vrot.slane %v217_v29, 2  ;;  %v226_v37 = vadd.f32 %v225_v30, %v224_v17  ;;  %v234_v38 = vrot.slane %v233_v31, 4  ;;  %v194_v34 = vadd.f32 %v193_v28, %v192_v26  ;;  %v2181_v17 = vld [vmem:[%s2459_s1 + $0x20] sm:$0xff]  ;;  %v2193_v30 = vld [vmem:[%s2459_s1 + $0x28] sm:$0xff]  ;;  %v2203_v28 = vld [vmem:[%s2459_s1 + $0x38] sm:$0xff] }
  0xb0   :  { %v202_v42 = vrot.slane %v201_v32, 1  ;;  %v210_v43 = vadd.f32 %v209_v35, %v208_v24  ;;  %v242_v44 = vadd.f32 %v241_v41, %v240_v36  ;;  %v249_v48 = vsel %vm185_vm1, %v2087_v49, 0.0 }
  0xb1   :  { %v219_v45 = vadd.f32 %v218_v33, %v217_v29  ;;  %v227_v46 = vrot.slane %v226_v37, 2  ;;  %v235_v47 = vadd.f32 %v234_v38, %v233_v31  ;;  %v250_v40 = vsel %vm185_vm1, %v2097_v58, 0.0  ;;  %v2198_v31 = vld [vmem:[%s2459_s1 + $0x30] sm:$0xff] }
  0xb2   :  { %v203_v51 = vadd.f32 %v202_v42, %v201_v32  ;;  %v211_v52 = vrot.slane %v210_v43, 1  ;;  %v243_v53 = vrot.slane %v242_v44, 4  ;;  %v251_v59 = vadd.f32 %v250_v40, %v249_v48  ;;  %v2220_v42 = vld [vmem:[%s2459_s1 + $0x48] sm:$0xff] }
  0xb3   :  { %v220_v55 = vrot.slane %v219_v45, 1  ;;  %v228_v56 = vadd.f32 %v227_v46, %v226_v37  ;;  %v236_v57 = vrot.slane %v235_v47, 2  ;;  %v1509_v2 = vpack.c.bf16 %v664_v50, %v663_v39  ;;  %v2232_v50 = vld [vmem:[%s2459_s1 + $0x50] sm:$0xff] }
  0xb4   :  { %v212_v62 = vadd.f32 %v211_v52, %v210_v43  ;;  %v244_v49 = vadd.f32 %v243_v53, %v242_v44  ;;  %v584_v63 = vsel %vm490_vm2, %v203_v51, %v194_v34  ;;  %v252_v4 = vrot.slane %v251_v59, 4  ;;  %v2215_v34 = vld [vmem:[%s2459_s1 + $0x40] sm:$0xff]  ;;  %v2237_v51 = vld [vmem:[%s2459_s1 + $0x58] sm:$0xff] }
  0xb5   :  { %v221_v18 = vadd.f32 %v220_v55, %v219_v45  ;;  %v229_v15 = vrot.slane %v228_v56, 1  ;;  %v237_v58 = vadd.f32 %v236_v57, %v235_v47  ;;  %1510 = vmatpush3.bf16.msra.mxu0 %v1509_v2  ;;  %v1515_v9 = vpack.c.bf16 %v2146_v14, %v2144_v54  ;;  %v2252_v2 = vld [vmem:[%s2459_s1 + $0x68] sm:$0xff] }
  0xb6   :  { %v245_v7 = vrot.slane %v244_v49, 2  ;;  %v585_v8 = vsel %vm492_vm3, %v212_v62, %v584_v63  ;;  %v1512_v20 = vpack.c.bf16 %v666_v61, %v665_v60  ;;  %v253_v12 = vadd.f32 %v252_v4, %v251_v59  ;;  %1511 = vmatprep.subr.bf16.mxu0 %v1789_v0  ;;  %v2247_v61 = vld [vmem:[%s2459_s1 + $0x60] sm:$0xff] }
  0xb7   :  { %v230_v10 = vadd.f32 %v229_v15, %v228_v56  ;;  %v238_v11 = vrot.slane %v237_v58, 1  ;;  %v586_v21 = vsel %vm494_vm4, %v221_v18, %v585_v8  ;;  %v1518_v26 = vpack.c.bf16 %v2151_v5, %v2149_v3 }
  0xb8   :  { %v246_v19 = vadd.f32 %v245_v7, %v244_v49  ;;  %v330_v23 = vsel %vm185_vm1, %v2156_v6, 0.0  ;;  %v331_v24 = vsel %vm185_vm1, %v2161_v16, 0.0  ;;  %v254_v27 = vrot.slane %v253_v12, 2 }
  0xb9   :  { %v239_v25 = vadd.f32 %v238_v11, %v237_v58  ;;  %v587_v29 = vsel %vm496_vm5, %v230_v10, %v586_v21  ;;  %v332_v32 = vadd.f32 %v331_v24, %v330_v23  ;;  %1513 = vmatpush3.bf16.msra.mxu0 %v1512_v20  ;;  %v339_v36 = vsel %vm185_vm1, %v2171_v22, 0.0  ;;  %v2263_v11 = vld [vmem:[%s2459_s1 + $0x70] sm:$0xff] }
  0xba   :  { %v247_v35 = vrot.slane %v246_v19, 1  ;;  %v340_v33 = vsel %vm185_vm1, %v2176_v13, 0.0  ;;  %v348_v37 = vsel %vm185_vm1, %v2181_v17, 0.0  ;;  %v255_v38 = vadd.f32 %v254_v27, %v253_v12  ;;  %1520 = vmatprep.subr.bf16.mxu0 %v1789_v0 }
  0xbb   :  { %v588_v41 = vsel %vm498_vm6, %v239_v25, %v587_v29  ;;  %v333_v43 = vrot.slane %v332_v32, 4  ;;  %v341_v44 = vadd.f32 %v340_v33, %v339_v36  ;;  %v349_v46 = vsel %vm185_vm1, %v2193_v30, 0.0 }
  0xbc   :  { %v248_v45 = vadd.f32 %v247_v35, %v246_v19  ;;  %v357_v47 = vsel %vm185_vm1, %v2198_v31, 0.0  ;;  %v358_v48 = vsel %vm185_vm1, %v2203_v28, 0.0  ;;  %v256_v39 = vrot.slane %v255_v38, 1 }
  0xbd   :  { %v334_v52 = vadd.f32 %v333_v43, %v332_v32  ;;  %v342_v53 = vrot.slane %v341_v44, 4  ;;  %v350_v40 = vadd.f32 %v349_v46, %v348_v37  ;;  %v359_v56 = vadd.f32 %v358_v48, %v357_v47  ;;  %v2278_v32 = vld [vmem:[%s2459_s1 + $0x78] sm:$0xff] }
  0xbe   :  { %v589_v55 = vsel %vm500_vm7, %v248_v45, %v588_v41  ;;  %v366_v57 = vsel %vm185_vm1, %v2215_v34, 0.0  ;;  %v367_v59 = vsel %vm185_vm1, %v2220_v42, 0.0  ;;  %v257_v60 = vadd.f32 %v256_v39, %v255_v38 }
  0xbf   :  { %v335_v62 = vrot.slane %v334_v52, 2  ;;  %v343_v49 = vadd.f32 %v342_v53, %v341_v44  ;;  %v351_v63 = vrot.slane %v350_v40, 4  ;;  %v360_v18 = vrot.slane %v359_v56, 4 }
  0xc0   :  { %v368_v15 = vadd.f32 %v367_v59, %v366_v57  ;;  %v375_v58 = vsel %vm185_vm1, %v2232_v50, 0.0  ;;  %v376_v4 = vsel %vm185_vm1, %v2237_v51, 0.0  ;;  %v590_v7 = vsel %vm502_vm8, %v257_v60, %v589_v55 }
  0xc1   :  { %v336_v8 = vadd.f32 %v335_v62, %v334_v52  ;;  %v344_v20 = vrot.slane %v343_v49, 2  ;;  %v352_v10 = vadd.f32 %v351_v63, %v350_v40  ;;  %1377 = vmatmul.mubr.msk.f32.vlgmr.msra.gmra.mrb[0].mxu1 %vm185_vm1, %v590_v7  ;;  %v361_v12 = vadd.f32 %v360_v18, %v359_v56 }
  0xc2   :  { %v369_v21 = vrot.slane %v368_v15, 4  ;;  %v377_v19 = vadd.f32 %v376_v4, %v375_v58  ;;  %v384_v23 = vsel %vm185_vm1, %v2247_v61, 0.0  ;;  %1516 = vmatpush3.bf16.msra.mxu1 %v1515_v9  ;;  %v385_v29 = vsel %vm185_vm1, %v2252_v2, 0.0  ;;  %1398 = vmatprep.mubr.msk.f32.mxu1 %vm1790_vm0, %v1791_v1 }
  0xc3   :  { %v337_v24 = vrot.slane %v336_v8, 1  ;;  %v345_v25 = vadd.f32 %v344_v20, %v343_v49  ;;  %v353_v27 = vrot.slane %v352_v10, 2  ;;  %1517 = vmatprep.subr.bf16.mxu1 %v1789_v0  ;;  %v362_v35 = vrot.slane %v361_v12, 2 }
  0xc4   :  { %v370_v36 = vadd.f32 %v369_v21, %v368_v15  ;;  %v378_v54 = vrot.slane %v377_v19, 4  ;;  %v386_v14 = vadd.f32 %v385_v29, %v384_v23  ;;  %v393_v38 = vsel %vm185_vm1, %v2263_v11, 0.0 }
  0xc5   :  { %v338_v9 = vadd.f32 %v337_v24, %v336_v8  ;;  %v346_v33 = vrot.slane %v345_v25, 1  ;;  %v354_v37 = vadd.f32 %v353_v27, %v352_v10  ;;  %v363_v41 = vadd.f32 %v362_v35, %v361_v12 }
  0xc6   :  { %v371_v43 = vrot.slane %v370_v36, 2  ;;  %v379_v44 = vadd.f32 %v378_v54, %v377_v19  ;;  %v387_v45 = vrot.slane %v386_v14, 4  ;;  %1519 = vmatpush3.bf16.msra.mxu1 %v1518_v26  ;;  %v394_v48 = vsel %vm185_vm1, %v2278_v32, 0.0 }
  0xc7   :  { %v347_v46 = vadd.f32 %v346_v33, %v345_v25  ;;  %v355_v47 = vrot.slane %v354_v37, 1  ;;  %v402_v39 = vsel %vm185_vm1, %v2156_v6, -inf  ;;  %v364_v52 = vrot.slane %v363_v41, 1  ;;  %1532 = vmatprep.subr.bf16.mxu1 %v1789_v0 }
  0xc8   :  { %v372_v53 = vadd.f32 %v371_v43, %v370_v36  ;;  %v380_v40 = vrot.slane %v379_v44, 2  ;;  %v388_v55 = vadd.f32 %v387_v45, %v386_v14  ;;  %v395_v57 = vadd.f32 %v394_v48, %v393_v38 }
  0xc9   :  { %v356_v56 = vadd.f32 %v355_v47, %v354_v37  ;;  %v675_v59 = vsel %vm490_vm2, %v347_v46, %v338_v9  ;;  %v403_v3 = vsel %vm185_vm1, %v2161_v16, -inf  ;;  %v365_v5 = vadd.f32 %v364_v52, %v363_v41 }
  0xca   :  { %v373_v26 = vrot.slane %v372_v53, 1  ;;  %v381_v60 = vadd.f32 %v380_v40, %v379_v44  ;;  %v389_v62 = vrot.slane %v388_v55, 2  ;;  %v396_v49 = vrot.slane %v395_v57, 4 }
  0xcb   :  { %v676_v6 = vsel %vm492_vm3, %v356_v56, %v675_v59  ;;  %v404_v63 = vmax.f32 %v402_v39, %v403_v3  ;;  %v411_v18 = vsel %vm185_vm1, %v2171_v22, -inf  ;;  %v412_v16 = vsel %vm185_vm1, %v2176_v13, -inf }
  0xcc   :  { %v374_v15 = vadd.f32 %v373_v26, %v372_v53  ;;  %v382_v58 = vrot.slane %v381_v60, 1  ;;  %v390_v4 = vadd.f32 %v389_v62, %v388_v55  ;;  %v677_v7 = vsel %vm494_vm4, %v365_v5, %v676_v6 }
  0xcd   :  { %v397_v8 = vadd.f32 %v396_v49, %v395_v57  ;;  %v405_v20 = vrot.slane %v404_v63, 4  ;;  %v420_v10 = vsel %vm185_vm1, %v2181_v17, -inf  ;;  %v413_v23 = vmax.f32 %v411_v18, %v412_v16 }
  0xce   :  { %v383_v12 = vadd.f32 %v382_v58, %v381_v60  ;;  %v391_v21 = vrot.slane %v390_v4, 1  ;;  %v678_v19 = vsel %vm496_vm5, %v374_v15, %v677_v7  ;;  %v421_v25 = vsel %vm185_vm1, %v2193_v30, -inf }
  0xcf   :  { %v398_v24 = vrot.slane %v397_v8, 2  ;;  %v406_v22 = vmax.f32 %v404_v63, %v405_v20  ;;  %v429_v27 = vsel %vm185_vm1, %v2198_v31, -inf  ;;  %v414_v13 = vrot.slane %v413_v23, 4 }
  0xd0   :  { %v392_v29 = vadd.f32 %v391_v21, %v390_v4  ;;  %v679_v35 = vsel %vm498_vm6, %v383_v12, %v678_v19  ;;  %v422_v36 = vmax.f32 %v420_v10, %v421_v25  ;;  %v430_v14 = vsel %vm185_vm1, %v2203_v28, -inf  ;;  %v870_v21 = vld [vmem:[#allocation12] sm:$0xff] }
  0xd1   :  { %v399_v54 = vadd.f32 %v398_v24, %v397_v8  ;;  %v407_v17 = vrot.slane %v406_v22, 2  ;;  %v438_v9 = vsel %vm185_vm1, %v2215_v34, -inf  ;;  %v415_v37 = vmax.f32 %v413_v23, %v414_v13 }
  0xd2   :  { %v680_v33 = vsel %vm500_vm7, %v392_v29, %v679_v35  ;;  %v423_v30 = vrot.slane %v422_v36, 4  ;;  %v431_v38 = vmax.f32 %v429_v27, %v430_v14  ;;  %v439_v43 = vsel %vm185_vm1, %v2220_v42, -inf  ;;  %v872_v29 = vld [vmem:[#allocation12 + $0x10] sm:$0xff]  ;;  %v873_v35 = vld [vmem:[#allocation12 + $0x18] sm:$0xff] }
  0xd3   :  { %v400_v41 = vrot.slane %v399_v54, 1  ;;  %v408_v31 = vmax.f32 %v406_v22, %v407_v17  ;;  %v447_v44 = vsel %vm185_vm1, %v2232_v50, -inf  ;;  %v416_v45 = vrot.slane %v415_v37, 2 }
  0xd4   :  { %v424_v46 = vmax.f32 %v422_v36, %v423_v30  ;;  %v432_v47 = vrot.slane %v431_v38, 4  ;;  %v440_v28 = vmax.f32 %v438_v9, %v439_v43  ;;  %v448_v34 = vsel %vm185_vm1, %v2237_v51, -inf  ;;  %v875_v43 = vld [vmem:[#allocation12 + $0x28] sm:$0xff] }
  0xd5   :  { %v401_v48 = vadd.f32 %v400_v41, %v399_v54  ;;  %v409_v39 = vrot.slane %v408_v31, 1  ;;  %v456_v52 = vsel %vm185_vm1, %v2247_v61, -inf  ;;  %v417_v53 = vmax.f32 %v415_v37, %v416_v45  ;;  %v854_v45 = vld [vmem:[%s2466_s8 + $0x8] sm:$0xff] }
  0xd6   :  { %v425_v40 = vrot.slane %v424_v46, 2  ;;  %v433_v55 = vmax.f32 %v431_v38, %v432_v47  ;;  %v441_v56 = vrot.slane %v440_v28, 4  ;;  %v449_v50 = vmax.f32 %v447_v44, %v448_v34  ;;  %v853_v44 = vld [vmem:[%s2466_s8] sm:$0xff] }
  0xd7   :  { %v681_v42 = vsel %vm502_vm8, %v401_v48, %v680_v33  ;;  %v410_v57 = vmax.f32 %v408_v31, %v409_v39  ;;  %v457_v59 = vsel %vm185_vm1, %v2252_v2, -inf  ;;  %v418_v3 = vrot.slane %v417_v53, 1  ;;  %v874_v31 = vld [vmem:[#allocation12 + $0x20] sm:$0xff] }
  0xd8   :  { %1388 = vmatmul.mubr.msk.f32.vlgmr.msra.gmra.mrb[2].mxu0 %vm185_vm1, %v681_v42  ;;  %v426_v5 = vmax.f32 %v424_v46, %v425_v40  ;;  %v434_v26 = vrot.slane %v433_v55, 2  ;;  %v442_v51 = vmax.f32 %v440_v28, %v441_v56  ;;  %v450_v60 = vrot.slane %v449_v50, 4  ;;  %v856_v40 = vld [vmem:[%s2466_s8 + $0x18] sm:$0xff]  ;;  %v857_v42 = vld [vmem:[%s2466_s8 + $0x20] sm:$0xff] }
  0xd9   :  { %v458_v62 = vmax.f32 %v456_v52, %v457_v59  ;;  %v465_v61 = vsel %vm185_vm1, %v2263_v11, -inf  ;;  %v466_v49 = vsel %vm185_vm1, %v2278_v32, -inf  ;;  %1417 = vmatprep.mubr.msk.f32.mxu0 %vm1790_vm0, %v1791_v1  ;;  %v419_v6 = vmax.f32 %v417_v53, %v418_v3  ;;  %v871_v32 = vld [vmem:[#allocation12 + $0x8] sm:$0xff]  ;;  %v855_v53 = vld [vmem:[%s2466_s8 + $0x10] sm:$0xff] }
  0xda   :  { %v427_v63 = vrot.slane %v426_v5, 1  ;;  %v435_v2 = vmax.f32 %v433_v55, %v434_v26  ;;  %v443_v18 = vrot.slane %v442_v51, 2  ;;  %v451_v15 = vmax.f32 %v449_v50, %v450_v60  ;;  %v859_v59 = vld [vmem:[%s2466_s8 + $0x30] sm:$0xff]  ;;  %v860_v3 = vld [vmem:[%s2466_s8 + $0x38] sm:$0xff]  ;;  %v861_v26 = vld [vmem:[%s2466_s8 + $0x40] sm:$0xff] }
  0xdb   :  { %v459_v58 = vrot.slane %v458_v62, 4  ;;  %v467_v4 = vmax.f32 %v465_v61, %v466_v49  ;;  %v767_v16 = vsel %vm490_vm2, %v419_v6, %v410_v57  ;;  %v1521_v54 = vpack.c.bf16 %v871_v32, %v870_v21  ;;  %v858_v57 = vld [vmem:[%s2466_s8 + $0x28] sm:$0xff]  ;;  %v864_v61 = vld [vmem:[%s2466_s8 + $0x58] sm:$0xff]  ;;  %v865_v6 = vld [vmem:[%s2466_s8 + $0x60] sm:$0xff] }
  0xdc   :  { %v428_v7 = vmax.f32 %v426_v5, %v427_v63  ;;  %v436_v8 = vrot.slane %v435_v2, 1  ;;  %v444_v20 = vmax.f32 %v442_v51, %v443_v18  ;;  %v452_v10 = vrot.slane %v451_v15, 2  ;;  %v862_v51 = vld [vmem:[%s2466_s8 + $0x48] sm:$0xff]  ;;  %v1024_v21 = vld [vmem:[#allocation13 + $0x10] sm:$0xff] }
  0xdd   :  { %v460_v11 = vmax.f32 %v458_v62, %v459_v58  ;;  %v468_v12 = vrot.slane %v467_v4, 4  ;;  %1522 = vmatpush3.bf16.msra.mxu0 %v1521_v54  ;;  %v1524_v37 = vpack.c.bf16 %v873_v35, %v872_v29  ;;  %v1527_v48 = vpack.c.bf16 %v875_v43, %v874_v31  ;;  %v863_v62 = vld [vmem:[%s2466_s8 + $0x50] sm:$0xff]  ;;  %v866_v63 = vld [vmem:[%s2466_s8 + $0x68] sm:$0xff] }
  0xde   :  { %v437_v19 = vmax.f32 %v435_v2, %v436_v8  ;;  %v445_v23 = vrot.slane %v444_v20, 1  ;;  %v768_v24 = vsel %vm492_vm3, %v428_v7, %v767_v16  ;;  %v453_v22 = vmax.f32 %v451_v15, %v452_v10  ;;  %1523 = vmatprep.subr.bf16.mxu0 %v1789_v0  ;;  %v876_v2 = vld [vmem:[#allocation12 + $0x30] sm:$0xff]  ;;  %v877_v15 = vld [vmem:[#allocation12 + $0x38] sm:$0xff]  ;;  %v867_v58 = vld [vmem:[%s2466_s8 + $0x70] sm:$0xff] }
  0xdf   :  { %v461_v25 = vrot.slane %v460_v11, 2  ;;  %v469_v27 = vmax.f32 %v467_v4, %v468_v12  ;;  %v1533_v52 = vpack.c.bf16 %v854_v45, %v853_v44  ;;  %v1536_v56 = vpack.c.bf16 %v856_v40, %v855_v53  ;;  %v868_v4 = vld [vmem:[%s2466_s8 + $0x78] sm:$0xff]  ;;  %v852_v16 = vld [vmem:[#allocation2] sm:$0xff]  ;;  %v1022_v10 = vld [vmem:[#allocation13] sm:$0xff] }
  0xe0   :  { %v446_v13 = vmax.f32 %v444_v20, %v445_v23  ;;  %v769_v36 = vsel %vm494_vm4, %v437_v19, %v768_v24  ;;  %v454_v17 = vrot.slane %v453_v22, 1  ;;  %v1539_v50 = vpack.c.bf16 %v858_v57, %v857_v42  ;;  %v869_v20 = vld [vmem:[#allocation4] sm:$0xff]  ;;  %v1108_v44 = vld [vmem:[%s2469_s11 + $0x10] sm:$0xff]  ;;  %v1109_v45 = vld [vmem:[%s2469_s11 + $0x18] sm:$0xff] }
  0xe1   :  { %v462_v14 = vmax.f32 %v460_v11, %v461_v25  ;;  %v470_v9 = vrot.slane %v469_v27, 2  ;;  %1525 = vmatpush3.bf16.msra.mxu0 %v1524_v37  ;;  %v1542_v5 = vpack.c.bf16 %v860_v3, %v859_v59  ;;  %v1545_v60 = vpack.c.bf16 %v862_v51, %v861_v26  ;;  %v1023_v11 = vld [vmem:[#allocation13 + $0x8] sm:$0xff]  ;;  %v1025_v32 = vld [vmem:[#allocation13 + $0x18] sm:$0xff]  ;;  %v1192_v42 = vld [vmem:[%s2470_s12] sm:$0xff] }
  0xe2   :  { %v770_v33 = vsel %vm496_vm5, %v446_v13, %v769_v36  ;;  %v455_v30 = vmax.f32 %v453_v22, %v454_v17  ;;  %1526 = vmatprep.subr.bf16.mxu0 %v1789_v0  ;;  %v1548_v49 = vpack.c.bf16 %v864_v61, %v863_v62  ;;  %v1551_v18 = vpack.c.bf16 %v866_v63, %v865_v6  ;;  %v1107_v37 = vld [vmem:[%s2469_s11 + $0x8] sm:$0xff]  ;;  %v1194_v61 = vld [vmem:[%s2470_s12 + $0x10] sm:$0xff] }
  0xe3   :  { %v463_v38 = vrot.slane %v462_v14, 1  ;;  %v471_v41 = vmax.f32 %v469_v27, %v470_v9  ;;  %v1530_v7 = vpack.c.bf16 %v877_v15, %v876_v2  ;;  %v1554_v8 = vpack.c.bf16 %v868_v4, %v867_v58  ;;  %v1111_v53 = vld [vmem:[%s2469_s11 + $0x28] sm:$0xff] }
  0xe4   :  { %v771_v28 = vsel %vm498_vm6, %v455_v30, %v770_v33  ;;  %vm878_vm9 = vcmask 523264   ;;  %v1557_v12 = vpack.c.bf16 %v1023_v11, %v1022_v10  ;;  %v1560_v19 = vpack.c.bf16 %v1025_v32, %v1024_v21  ;;  %v1106_v33 = vld [vmem:[%s2469_s11] sm:$0xff]  ;;  %v1193_v57 = vld [vmem:[%s2470_s12 + $0x8] sm:$0xff] }
  0xe5   :  { %v464_v46 = vmax.f32 %v462_v14, %v463_v38  ;;  %v472_v47 = vrot.slane %v471_v41, 1  ;;  %1528 = vmatpush3.bf16.msra.mxu0 %v1527_v48  ;;  %v847_v36 = vlaneseq  ;;  %v152_v14 = vld [vmem:[%s2471_s13] sm:$0xf]  ;;  %v1563_v31 = vpack.c.bf16 %v1107_v37, %v1106_v33 }
  0xe6   :  { %1529 = vmatprep.subr.bf16.mxu0 %v1789_v0  ;;  %vm1273_vm10 = vcmask 7168  }
  0xe7   :  { %v473_v39 = vmax.f32 %v471_v41, %v472_v47  ;;  %v772_v34 = vsel %vm500_vm7, %v464_v46, %v771_v28  ;;  %v848_v54 = vshrl.u32 %v847_v36, 7  ;;  %v1566_v46 = vpack.c.bf16 %v1109_v45, %v1108_v44 }
  0xe9   :  { %v773_v55 = vsel %vm502_vm8, %v473_v39, %v772_v34  ;;  %1531 = vmatpush3.bf16.msra.mxu0 %v1530_v7  ;;  %v849_v17 = vsub.s32 0, %v848_v54  ;;  %v1102_v59 = vsub.s32 1, %v848_v54  ;;  %v1198_v4 = vsub.s32 3, %v848_v54 }
  0xea   :  { %1399 = vmatmul.mubr.msk.f32.vlgmr.msra.gmra.mrb[2].mxu1 %vm185_vm1, %v773_v55  ;;  %1556 = vmatprep.subr.bf16.mxu0 %v1789_v0  ;;  %v1113_v55 = vld [vmem:[%s2469_s11 + $0x38] sm:$0xff] }
  0xeb   :  { %1534 = vmatpush3.bf16.msra.mxu1 %v1533_v52  ;;  %1452 = vmatprep.mubr.msk.f32.mxu1 %vm1790_vm0, %v1791_v1  ;;  %v850_v9 = vrot.slane %v152_v14, %v849_v17  ;;  %v1110_v52 = vld [vmem:[%s2469_s11 + $0x20] sm:$0xff]  ;;  %v1103_v3 = vrot.slane %v152_v14, %v1102_v59  ;;  %v1199_v7 = vrot.slane %v152_v14, %v1198_v4 }
  0xec   :  { %1535 = vmatprep.subr.bf16.mxu1 %v1789_v0  ;;  %1418 = vmatmul.mubr.msk.f32.vlgmr.msra.gmra.mrb[4].mxu0 %vm878_vm9, %v869_v20  ;;  %v1569_v40 = vpack.c.bf16 %v1111_v53, %v1110_v52 }
  0xed   :  { %1463 = vmatprep.mubr.msk.f32.mxu0 %vm1790_vm0, %v1791_v1  ;;  %1558 = vmatpush3.bf16.msra.mxu0 %v1557_v12 }
  0xee   :  { %1559 = vmatprep.subr.bf16.mxu0 %v1789_v0 }
  0xef   :  { %1537 = vmatpush3.bf16.msra.mxu1 %v1536_v56 }
  0xf0   :  { %1538 = vmatprep.subr.bf16.mxu1 %v1789_v0 }
  0xf1   :  { %1561 = vmatpush3.bf16.msra.mxu0 %v1560_v19 }
  0xf2   :  { %1562 = vmatprep.subr.bf16.mxu0 %v1789_v0 }
  0xf3   :  { %1540 = vmatpush3.bf16.msra.mxu1 %v1539_v50  ;;  %v1575_v50 = vpack.c.bf16 %v1193_v57, %v1192_v42 }
  0xf4   :  { %1541 = vmatprep.subr.bf16.mxu1 %v1789_v0 }
  0xf7   :  { %1543 = vmatpush3.bf16.msra.mxu1 %v1542_v5 }
  0xf8   :  { %1544 = vmatprep.subr.bf16.mxu1 %v1789_v0 }
  0xfb   :  { %1546 = vmatpush3.bf16.msra.mxu1 %v1545_v60 }
  0xfc   :  { %1547 = vmatprep.subr.bf16.mxu1 %v1789_v0 }
  0xff   :  { %1549 = vmatpush3.bf16.msra.mxu1 %v1548_v49  ;;  %v1195_v49 = vld [vmem:[%s2470_s12 + $0x18] sm:$0xff] }
 0x100   :  { %1550 = vmatprep.subr.bf16.mxu1 %v1789_v0  ;;  %v1578_v6 = vpack.c.bf16 %v1195_v49, %v1194_v61 }
 0x103   :  { %1552 = vmatpush3.bf16.msra.mxu1 %v1551_v18 }
 0x104   :  { %1553 = vmatprep.subr.bf16.mxu1 %v1789_v0 }
 0x107   :  { %1555 = vmatpush3.bf16.msra.mxu1 %v1554_v8 }
 0x108   :  { %1574 = vmatprep.subr.bf16.mxu1 %v1789_v0 }
 0x10a   :  { %1453 = vmatmul.mubr.f32.vlgmr.msra.gmra.mrb[4].mxu1 %v852_v16 }
 0x10b   :  { %1493 = vmatprep.mubr.msk.f32.mxu1 %vm1790_vm0, %v1791_v1  ;;  %1576 = vmatpush3.bf16.msra.mxu1 %v1575_v50 }
 0x10c   :  { %1577 = vmatprep.subr.bf16.mxu1 %v1789_v0 }
 0x10f   :  { %1579 = vmatpush3.bf16.msra.mxu1 %v1578_v6 }
 0x180   :  { %v572_v23 = vpop.f32.mrb[0].mxu0 }
 0x181   :  { %v1367_v24 = vpop.f32.mrb[1].mxu0 }
 0x194   :  { %v659_v22 = vpop.f32.mrb[0].mxu1 }
 0x195   :  { %v660_v25 = vadd.f32 %v659_v22, %v572_v23  ;;  %v1378_v27 = vpop.f32.mrb[1].mxu1 }
 0x1ab   :  { %v750_v29 = vpop.f32.mrb[2].mxu0 }
 0x1ac   :  { %v754_v35 = vadd.f32 %v750_v29, %v660_v25  ;;  %v1389_v13 = vpop.f32.mrb[3].mxu0 }
 0x1bd   :  { %v842_v30 = vpop.f32.mrb[2].mxu1 }
 0x1be   :  { %v846_v38 = vadd.f32 %v842_v30, %v754_v35  ;;  %v1400_v41 = vpop.f32.mrb[3].mxu1 }
 0x1bf   :  { %v948_v47 = vpop.f32.mrb[4].mxu0 }
 0x1c0   :  { %v851_v43 = vadd.f32 %v850_v9, %v846_v38  ;;  %v1419_v28 = vpop.f32.mrb[5].mxu0 }
 0x1c2   :  { %1464 = vmatmul.mubr.msk.f32.vlgmr.msra.gmra.mrb[6].mxu0 %vm185_vm1, %v851_v43 }
 0x1c3   :  { %1564 = vmatpush3.bf16.msra.mxu0 %v1563_v31  ;;  %1482 = vmatprep.mubr.msk.f32.mxu0 %vm1790_vm0, %v1791_v1  ;;  %v1112_v1 = vld [vmem:[%s2469_s11 + $0x30] sm:$0xff] }
 0x1c4   :  { %1565 = vmatprep.subr.bf16.mxu0 %v1789_v0  ;;  %v1572_v56 = vpack.c.bf16 %v1113_v55, %v1112_v1 }
 0x1c7   :  { %1567 = vmatpush3.bf16.msra.mxu0 %v1566_v46 }
 0x1c8   :  { %1568 = vmatprep.subr.bf16.mxu0 %v1789_v0 }
 0x1cb   :  { %1570 = vmatpush3.bf16.msra.mxu0 %v1569_v40 }
 0x1cc   :  { %1571 = vmatprep.subr.bf16.mxu0 %v1789_v0  ;;  %v1116_v0 = vsub.s32 2, %v848_v54 }
 0x1ce   :  { %v1117_v63 = vrot.slane %v152_v14, %v1116_v0 }
 0x1cf   :  { %1573 = vmatpush3.bf16.msra.mxu0 %v1572_v56 }
 0x1dd   :  { %v1018_v48 = vpop.f32.mrb[4].mxu1 }
 0x1de   :  { %v1019_v39 = vadd.f32 %v1018_v48, %v948_v47  ;;  %v1454_v34 = vpop.f32.mrb[5].mxu1 }
 0x295   :  { %v1095_v5 = vpop.f32.mrb[6].mxu0 }
 0x296   :  { %v1099_v26 = vadd.f32 %v1095_v5, %v1019_v39  ;;  %v1465_v51 = vpop.f32.mrb[7].mxu0 }
 0x298   :  { %v1104_v60 = vadd.f32 %v1103_v3, %v1099_v26 }
 0x29a   :  { %v1105_v62 = vmax.f32 %v1104_v60, 0.0 }
 0x29c   :  { %1483 = vmatmul.mubr.msk.f32.vlgmr.msra.gmra.mrb[8].mxu0 %vm878_vm9, %v1105_v62 }
 0x36f   :  { %v1187_v2 = vpop.f32.mrb[8].mxu0 }
 0x370   :  { %v1188_v18 = vadd.f32 %v1187_v2, %v1117_v63  ;;  %v1484_v15 = vpop.f32.mrb[9].mxu0 }
 0x372   :  { %v1191_v58 = vmax.f32 %v1188_v18, 0.0 }
 0x374   :  { %1494 = vmatmul.mubr.msk.f32.vlgmr.msra.gmra.mrb[6].mxu1 %vm185_vm1, %v1191_v58 }
 0x447   :  { %v1269_v8 = vpop.f32.mrb[6].mxu1 }
 0x448   :  { %v1270_v20 = vadd.f32 %v1269_v8, %v1199_v7  ;;  %v1495_v16 = vpop.f32.mrb[7].mxu1 }
 0x44a   :  { %1274 = vst.msk [vmem:[%s2472_s14] sm:$0xff] %vm1273_vm10, %v1270_v20 }
 0x44b   :  { %1279 = vsyncpa [#allocation3], 1 }
 0x44c   :  { %1280 = vsyncpa [#allocation5], 1 }
 0x44d   :  { %1281 = vsyncpa [#allocation8], 1 }
 0x44e   :  { %1282 = vsyncpa [#allocation11], 1 }
 0x44f   :  { %1283 = vsyncpa [#allocation14], 1 }

</bundles_post_ra>
